<compile_context>
chip_gen: v5e
topology: v5e:2x2
jax: 0.10.0
libtpu: 0.0.40
codegen_flags: <defaults>
</compile_context>

<pallas_src>
import jax
import jax.numpy as jnp
from jax.experimental import pallas as pl
from jax.experimental.pallas import tpu as pltpu


# ----------------------------------------------------------------------------- kernels
def _fused_mse_kernel(pred_ref, logits_ref, aug_ref, mixup_ref, out_ref):
    """All four softmax-MSE consistency sums of the u_mixup branch in one pass.

    out_ref[0, :] = [ sum((s_aug - s_log)^2),    # loss_cons_aug
                      sum((s_prd - s_mix)^2),    # loss_mixup
                      sum((s_log - s_prd)^2),    # loss_cons_mixup
                      sum((s_prd - s_aug)^2) ]   # loss_cons_aug_mixup
    (sums only; the /n_classes is applied in the JAX wrapper.)
    """
    def _softmax(ref):
        x = ref[...].astype(jnp.float32)                       # f32 math (v5e has no bf16 VPU/EUP)
        m = jnp.max(x, axis=-1, keepdims=True)
        e = jnp.exp(x - m)
        inv = pl.reciprocal(jnp.sum(e, axis=-1, keepdims=True), approx=True)
        return e * inv

    s_prd = _softmax(pred_ref)
    s_log = _softmax(logits_ref)
    s_aug = _softmax(aug_ref)
    s_mix = _softmax(mixup_ref)

    def _sq(d):
        return jnp.sum(d * d)

    out_ref[0, 0] = _sq(s_aug - s_log)
    out_ref[0, 1] = _sq(s_prd - s_mix)
    out_ref[0, 2] = _sq(s_log - s_prd)
    out_ref[0, 3] = _sq(s_prd - s_aug)


def _fused_kl_kernel(pred_ref, logits_ref, aug_ref, mixup_ref, out_ref):
    """All four softmax-KL consistency sums (F.kl_div(log_softmax(a), softmax(b), 'sum'))."""
    def _logp_and_p(ref):
        x = ref[...].astype(jnp.float32)
        m = jnp.max(x, axis=-1, keepdims=True)
        sh = x - m
        e = jnp.exp(sh)
        s = jnp.sum(e, axis=-1, keepdims=True)
        logp = sh - jnp.log(s)                                  # exact log-prob (no log(0))
        p = e * pl.reciprocal(s, approx=True)
        return logp, p

    lp_prd, p_prd = _logp_and_p(pred_ref)
    lp_log, p_log = _logp_and_p(logits_ref)
    lp_aug, p_aug = _logp_and_p(aug_ref)
    lp_mix, p_mix = _logp_and_p(mixup_ref)

    def _kl(logq_input, p_target, logp_target):
        # sum( p_tgt * (log p_tgt - log_softmax(input)) ); underflowed p_tgt==0 -> term 0.
        return jnp.sum(p_target * (logp_target - logq_input))

    out_ref[0, 0] = _kl(lp_aug, p_log, lp_log)   # cons(logits_aug, logits)
    out_ref[0, 1] = _kl(lp_prd, p_mix, lp_mix)   # cons(pred,       logits_mixup)
    out_ref[0, 2] = _kl(lp_log, p_prd, lp_prd)   # cons(logits,     pred)
    out_ref[0, 3] = _kl(lp_prd, p_aug, lp_aug)   # cons(pred,       logits_aug)


def _ce_dual_kernel(logits_ref, labels_ref, out_ref):
    """Two CrossEntropyLoss(reduction='sum') that share one log-sum-exp.

    labels_ref: (B, 2) int32 — column 0 = target, column 1 = target_bg.
    out_ref[0, 0] / out_ref[0, 1] = the two CE sums.
    """
    x = logits_ref[...].astype(jnp.float32)                                 # (B, C)
    lab = labels_ref[...]                                                    # (B, 2)
    m = jnp.max(x, axis=-1, keepdims=True)
    lse = m + jnp.log(jnp.sum(jnp.exp(x - m), axis=-1, keepdims=True))       # (B, 1)
    cls_idx = jax.lax.broadcasted_iota(jnp.int32, x.shape, 1)                # (B, C)
    t1 = jnp.sum(jnp.where(cls_idx == lab[:, 0:1], x, 0.0), axis=-1, keepdims=True)
    t2 = jnp.sum(jnp.where(cls_idx == lab[:, 1:2], x, 0.0), axis=-1, keepdims=True)
    out_ref[0, 0] = jnp.sum(lse - t1)
    out_ref[0, 1] = jnp.sum(lse - t2)


def _ce_single_kernel(logits_ref, labels_ref, out_ref):
    """CrossEntropyLoss(reduction='sum') with integer class labels (B, 1)."""
    x = logits_ref[...].astype(jnp.float32)
    lab = labels_ref[...]                                                    # (B, 1)
    m = jnp.max(x, axis=-1, keepdims=True)
    lse = m + jnp.log(jnp.sum(jnp.exp(x - m), axis=-1, keepdims=True))
    cls_idx = jax.lax.broadcasted_iota(jnp.int32, x.shape, 1)
    tgt = jnp.sum(jnp.where(cls_idx == lab, x, 0.0), axis=-1, keepdims=True)
    out_ref[0, 0] = jnp.sum(lse - tgt)


# ----------------------------------------------------------------------------- wrappers
_VMEM = pl.BlockSpec(memory_space=pltpu.MemorySpace.VMEM)
_SMEM_OUT = pl.BlockSpec(memory_space=pltpu.MemorySpace.SMEM)


def fused_consistency_losses(pred, logits, logits_aug, logits_mixup, cons_mode):
    """Returns (loss_cons_aug, loss_mixup, loss_cons_mixup, loss_cons_aug_mixup),
    each already divided by n_classes (matching softmax_{mse,kl}_loss)."""
    assert pred.shape == logits.shape == logits_aug.shape == logits_mixup.shape
    kernel = _fused_mse_kernel if cons_mode == 'mse' else _fused_kl_kernel
    out = pl.pallas_call(
        kernel,
        out_shape=jax.ShapeDtypeStruct((1, 4), jnp.float32),
        in_specs=[_VMEM] * 4,
        out_specs=_SMEM_OUT,
    )(pred, logits, logits_aug, logits_mixup)
    n_classes = pred.shape[1]
    scaled = out[0] / jnp.float32(n_classes)
    return scaled[0], scaled[1], scaled[2], scaled[3]


def cross_entropy_dual_sum(logits, labels_a, labels_b):
    """Both CE sums (reduction='sum') for the same logits, one kernel launch."""
    labels = jnp.stack(
        [jnp.asarray(labels_a).astype(jnp.int32).reshape(-1),
         jnp.asarray(labels_b).astype(jnp.int32).reshape(-1)], axis=1)       # (B, 2)
    out = pl.pallas_call(
        _ce_dual_kernel,
        out_shape=jax.ShapeDtypeStruct((1, 2), jnp.float32),
        in_specs=[_VMEM, _VMEM],
        out_specs=_SMEM_OUT,
    )(logits, labels)
    return out[0, 0], out[0, 1]


def cross_entropy_sum(logits, labels):
    labels = jnp.asarray(labels).astype(jnp.int32).reshape(-1, 1)
    out = pl.pallas_call(
        _ce_single_kernel,
        out_shape=jax.ShapeDtypeStruct((1, 1), jnp.float32),
        in_specs=[_VMEM, _VMEM],
        out_specs=_SMEM_OUT,
    )(logits, labels)
    return out[0, 0]


# ----------------------------------------------------------------------------- module
class Loss:
    """JAX/Pallas re-implementation of semixup.losses.Loss (forward pass)."""

    def __init__(self, cons_coef=2.0, cons_mode='mse', mixup_coef=2.0,
                 cons_mixup_coef=4.0, use_cons=False, elim_loss=''):
        if cons_mode not in ('mse', 'kl'):
            raise ValueError(f'Unsupported cons_mode {cons_mode}')
        self._cons_mode = cons_mode
        self._cons_coef = cons_coef
        self._mixup_coef = mixup_coef
        self._cons_mixup_coef = cons_mixup_coef
        self._use_cons = use_cons
        self._n_minibatches = 1.0
        self._elim_loss = elim_loss
        self.losses = {'loss_cls': None, 'loss_cons': None}
        if use_cons and mixup_coef is None:
            raise ValueError('Must input coefficient of consistency')

    def __call__(self, pred, target):
        n_minibatch_size = pred.shape[0]
        denom = self._n_minibatches * n_minibatch_size
        name = target['name']

        if name == 'u_mixup':
            if target['logits_mixup'].ndim != 2:
                raise ValueError('Not support augmented logits with shape '
                                 f'{target["logits_mixup"].shape}')
            # one fused kernel launch for all four consistency sums
            (loss_cons_aug, loss_mixup,
             loss_cons_mixup, loss_cons_aug_mixup) = fused_consistency_losses(
                pred, target['logits'], target['logits_aug'],
                target['logits_mixup'], self._cons_mode)

            loss = jnp.float32(0.0)
            if '1' in self._elim_loss:
                self.losses['loss_cons'] = None
            else:
                self.losses['loss_cons'] = self._cons_coef * loss_cons_aug / denom
                loss = loss + self.losses['loss_cons']
            if '2' in self._elim_loss:
                self.losses['loss_mixup'] = None
            else:
                self.losses['loss_mixup'] = self._mixup_coef * loss_mixup / denom
                loss = loss + self.losses['loss_mixup']
            if '3' in self._elim_loss:
                self.losses['loss_cons_mixup'] = None
                self.losses['loss_cons_aug_mixup'] = None
            else:
                self.losses['loss_cons_mixup'] = self._cons_mixup_coef * loss_cons_mixup / denom
                self.losses['loss_cons_aug_mixup'] = self._cons_mixup_coef * loss_cons_aug_mixup / denom
                loss = loss + self.losses['loss_cons_mixup'] + self.losses['loss_cons_aug_mixup']
            self.losses['loss_cls'] = None
            self.losses['loss'] = loss

        elif name == 'l_mixup':
            alpha = target['alpha']
            # one fused kernel launch for both cross-entropies (shared logsumexp)
            ce_a, ce_b = cross_entropy_dual_sum(pred, target['target'], target['target_bg'])
            loss_cls = alpha * ce_a + (1.0 - alpha) * ce_b
            self.losses['loss_cons_aug_mixup'] = None
            self.losses['loss_cons'] = None
            self.losses['loss_mixup'] = None
            self.losses['loss_cons_mixup'] = None
            self.losses['loss_cls'] = loss_cls / denom
            self.losses['loss'] = self.losses['loss_cls']

        elif name == 'l_norm':
            loss_cls = cross_entropy_sum(pred, target['target'])
            self.losses['loss_cons_aug_mixup'] = None
            self.losses['loss_cons'] = None
            self.losses['loss_mixup'] = None
            self.losses['loss_cons_mixup'] = None
            self.losses['loss_cls'] = loss_cls / denom
            self.losses['loss'] = self.losses['loss_cls']

        else:
            raise ValueError(f'Not support target name {name}')

        return self.losses['loss']

    def get_loss_by_name(self, name):
        return self.losses.get(name, None)


# ----------------------------------------------------------------------------- reference (pure JAX, for sanity check)
def _ref_softmax_mse(a, b):
    sa = jax.nn.softmax(a, axis=1)
    sb = jax.nn.softmax(b, axis=1)
    return jnp.sum((sa - sb) ** 2) / a.shape[1]


def _ref_softmax_kl(a, b):
    logpa = jax.nn.log_softmax(a, axis=1)
    pb = jax.nn.softmax(b, axis=1)
    return jnp.sum(pb * (jnp.log(pb) - logpa)) / b.shape[1]


def _ref_ce_sum(x, t):
    logp = jax.nn.log_softmax(x, axis=1)
    return -jnp.sum(logp[jnp.arange(x.shape[0]), t])


# ----------------------------------------------------------------------------- main
if __name__ == "__main__":
    key = jax.random.PRNGKey(0)
    B, C = 8, 5  # small shapes: 8 samples, 5 classes (KL grading in semixup)
    k1, k2, k3, k4, k5, k6 = jax.random.split(key, 6)
    pred = jax.random.normal(k1, (B, C), jnp.float32)
    logits = jax.random.normal(k2, (B, C), jnp.float32)
    logits_aug = jax.random.normal(k3, (B, C), jnp.float32)
    logits_mixup = jax.random.normal(k4, (B, C), jnp.float32)
    tgt1 = jax.random.randint(k5, (B,), 0, C)
    tgt2 = jax.random.randint(k6, (B,), 0, C)

    u_target = {'name': 'u_mixup', 'logits': logits,
                'logits_aug': logits_aug, 'logits_mixup': logits_mixup}

    loss_mse = Loss(cons_mode='mse')  # defaults: cons_coef=2, mixup_coef=2, cons_mixup_coef=4
    loss_kl = Loss(cons_mode='kl')

    # branch 1: unlabeled mixup consistency (mse and kl variants)
    l_u_mse = loss_mse(pred, u_target)
    l_u_kl = loss_kl(pred, u_target)
    # branch 2: labeled mixup cross-entropy
    l_lm = loss_mse(pred, {'name': 'l_mixup', 'target': tgt1,
                           'target_bg': tgt2, 'alpha': 0.7})
    # branch 3: plain labeled cross-entropy
    l_ln = loss_mse(pred, {'name': 'l_norm', 'target': tgt1})

    jax.block_until_ready((l_u_mse, l_u_kl, l_lm, l_ln))

    # sanity check vs pure-JAX reference
    ref_u_mse = (2.0 * _ref_softmax_mse(logits_aug, logits)
                 + 2.0 * _ref_softmax_mse(pred, logits_mixup)
                 + 4.0 * _ref_softmax_mse(logits, pred)
                 + 4.0 * _ref_softmax_mse(pred, logits_aug)) / B
    ref_u_kl = (2.0 * _ref_softmax_kl(logits_aug, logits)
                + 2.0 * _ref_softmax_kl(pred, logits_mixup)
                + 4.0 * _ref_softmax_kl(logits, pred)
                + 4.0 * _ref_softmax_kl(pred, logits_aug)) / B
    ref_lm = (0.7 * _ref_ce_sum(pred, tgt1) + 0.3 * _ref_ce_sum(pred, tgt2)) / B
    ref_ln = _ref_ce_sum(pred, tgt1) / B

    # approx reciprocal in the softmax -> slightly looser tolerance on consistency losses
    assert jnp.allclose(l_u_mse, ref_u_mse, rtol=1e-2, atol=1e-4), (l_u_mse, ref_u_mse)
    assert jnp.allclose(l_u_kl, ref_u_kl, rtol=1e-2, atol=1e-4), (l_u_kl, ref_u_kl)
    assert jnp.allclose(l_lm, ref_lm, rtol=1e-3, atol=1e-5), (l_lm, ref_lm)
    assert jnp.allclose(l_ln, ref_ln, rtol=1e-3, atol=1e-5), (l_ln, ref_ln)

    print("KERNEL_OK")
</pallas_src>

<mosaic_0001>
module attributes {stable_mosaic.version = 11 : i64} {
  func.func @_fused_mse_kernel(%arg0: memref<8x5xf32, #tpu.memory_space<vmem>>, %arg1: memref<8x5xf32, #tpu.memory_space<vmem>>, %arg2: memref<8x5xf32, #tpu.memory_space<vmem>>, %arg3: memref<8x5xf32, #tpu.memory_space<vmem>>, %arg4: memref<1x4xf32, #tpu.memory_space<smem>>) attributes {dimension_semantics = [], scalar_prefetch = 0 : i64, scratch_operands = 0 : i64, tpu.core_type = #tpu.core_type<tc>} {
    %c0 = arith.constant 0 : index
    %c0_0 = arith.constant 0 : index
    %0 = vector.load %arg0[%c0, %c0_0] : memref<8x5xf32, #tpu.memory_space<vmem>>, vector<8x5xf32>
    %cst = arith.constant dense<0xFF800000> : vector<8xf32>
    %1 = vector.multi_reduction <maximumf>, %0, %cst [1] : vector<8x5xf32> to vector<8xf32>
    %2 = vector.shape_cast %1 : vector<8xf32> to vector<8x1xf32>
    %3 = vector.broadcast %2 : vector<8x1xf32> to vector<8x5xf32>
    %4 = arith.subf %0, %3 : vector<8x5xf32>
    %5 = math.exp %4 : vector<8x5xf32>
    %cst_1 = arith.constant dense<0.000000e+00> : vector<8xf32>
    %6 = vector.multi_reduction <add>, %5, %cst_1 [1] : vector<8x5xf32> to vector<8xf32>
    %7 = vector.shape_cast %6 : vector<8xf32> to vector<8x1xf32>
    %8 = tpu.reciprocal %7 {approx = true} : vector<8x1xf32> -> vector<8x1xf32>
    %9 = vector.broadcast %8 : vector<8x1xf32> to vector<8x5xf32>
    %10 = arith.mulf %5, %9 : vector<8x5xf32>
    %c0_2 = arith.constant 0 : index
    %c0_3 = arith.constant 0 : index
    %11 = vector.load %arg1[%c0_2, %c0_3] : memref<8x5xf32, #tpu.memory_space<vmem>>, vector<8x5xf32>
    %cst_4 = arith.constant dense<0xFF800000> : vector<8xf32>
    %12 = vector.multi_reduction <maximumf>, %11, %cst_4 [1] : vector<8x5xf32> to vector<8xf32>
    %13 = vector.shape_cast %12 : vector<8xf32> to vector<8x1xf32>
    %14 = vector.broadcast %13 : vector<8x1xf32> to vector<8x5xf32>
    %15 = arith.subf %11, %14 : vector<8x5xf32>
    %16 = math.exp %15 : vector<8x5xf32>
    %cst_5 = arith.constant dense<0.000000e+00> : vector<8xf32>
    %17 = vector.multi_reduction <add>, %16, %cst_5 [1] : vector<8x5xf32> to vector<8xf32>
    %18 = vector.shape_cast %17 : vector<8xf32> to vector<8x1xf32>
    %19 = tpu.reciprocal %18 {approx = true} : vector<8x1xf32> -> vector<8x1xf32>
    %20 = vector.broadcast %19 : vector<8x1xf32> to vector<8x5xf32>
    %21 = arith.mulf %16, %20 : vector<8x5xf32>
    %c0_6 = arith.constant 0 : index
    %c0_7 = arith.constant 0 : index
    %22 = vector.load %arg2[%c0_6, %c0_7] : memref<8x5xf32, #tpu.memory_space<vmem>>, vector<8x5xf32>
    %cst_8 = arith.constant dense<0xFF800000> : vector<8xf32>
    %23 = vector.multi_reduction <maximumf>, %22, %cst_8 [1] : vector<8x5xf32> to vector<8xf32>
    %24 = vector.shape_cast %23 : vector<8xf32> to vector<8x1xf32>
    %25 = vector.broadcast %24 : vector<8x1xf32> to vector<8x5xf32>
    %26 = arith.subf %22, %25 : vector<8x5xf32>
    %27 = math.exp %26 : vector<8x5xf32>
    %cst_9 = arith.constant dense<0.000000e+00> : vector<8xf32>
    %28 = vector.multi_reduction <add>, %27, %cst_9 [1] : vector<8x5xf32> to vector<8xf32>
    %29 = vector.shape_cast %28 : vector<8xf32> to vector<8x1xf32>
    %30 = tpu.reciprocal %29 {approx = true} : vector<8x1xf32> -> vector<8x1xf32>
    %31 = vector.broadcast %30 : vector<8x1xf32> to vector<8x5xf32>
    %32 = arith.mulf %27, %31 : vector<8x5xf32>
    %c0_10 = arith.constant 0 : index
    %c0_11 = arith.constant 0 : index
    %33 = vector.load %arg3[%c0_10, %c0_11] : memref<8x5xf32, #tpu.memory_space<vmem>>, vector<8x5xf32>
    %cst_12 = arith.constant dense<0xFF800000> : vector<8xf32>
    %34 = vector.multi_reduction <maximumf>, %33, %cst_12 [1] : vector<8x5xf32> to vector<8xf32>
    %35 = vector.shape_cast %34 : vector<8xf32> to vector<8x1xf32>
    %36 = vector.broadcast %35 : vector<8x1xf32> to vector<8x5xf32>
    %37 = arith.subf %33, %36 : vector<8x5xf32>
    %38 = math.exp %37 : vector<8x5xf32>
    %cst_13 = arith.constant dense<0.000000e+00> : vector<8xf32>
    %39 = vector.multi_reduction <add>, %38, %cst_13 [1] : vector<8x5xf32> to vector<8xf32>
    %40 = vector.shape_cast %39 : vector<8xf32> to vector<8x1xf32>
    %41 = tpu.reciprocal %40 {approx = true} : vector<8x1xf32> -> vector<8x1xf32>
    %42 = vector.broadcast %41 : vector<8x1xf32> to vector<8x5xf32>
    %43 = arith.mulf %38, %42 : vector<8x5xf32>
    %44 = arith.subf %32, %21 : vector<8x5xf32>
    %45 = arith.mulf %44, %44 : vector<8x5xf32>
    %46 = vector.shape_cast %45 : vector<8x5xf32> to vector<1x8x5xf32>
    %cst_14 = arith.constant dense<0.000000e+00> : vector<1xf32>
    %47 = vector.multi_reduction <add>, %46, %cst_14 [1, 2] : vector<1x8x5xf32> to vector<1xf32>
    %48 = vector.shape_cast %47 : vector<1xf32> to vector<1x1x1xf32>
    %49 = vector.extract %48[0, 0, 0] : f32 from vector<1x1x1xf32>
    %c0_15 = arith.constant 0 : index
    %c0_16 = arith.constant 0 : index
    %50 = memref.load %arg4[%c0_15, %c0_16] : memref<1x4xf32, #tpu.memory_space<smem>>
    memref.store %49, %arg4[%c0_15, %c0_16] : memref<1x4xf32, #tpu.memory_space<smem>>
    %51 = arith.subf %10, %43 : vector<8x5xf32>
    %52 = arith.mulf %51, %51 : vector<8x5xf32>
    %53 = vector.shape_cast %52 : vector<8x5xf32> to vector<1x8x5xf32>
    %cst_17 = arith.constant dense<0.000000e+00> : vector<1xf32>
    %54 = vector.multi_reduction <add>, %53, %cst_17 [1, 2] : vector<1x8x5xf32> to vector<1xf32>
    %55 = vector.shape_cast %54 : vector<1xf32> to vector<1x1x1xf32>
    %56 = vector.extract %55[0, 0, 0] : f32 from vector<1x1x1xf32>
    %c0_18 = arith.constant 0 : index
    %c1 = arith.constant 1 : index
    %57 = memref.load %arg4[%c0_18, %c1] : memref<1x4xf32, #tpu.memory_space<smem>>
    memref.store %56, %arg4[%c0_18, %c1] : memref<1x4xf32, #tpu.memory_space<smem>>
    %58 = arith.subf %21, %10 : vector<8x5xf32>
    %59 = arith.mulf %58, %58 : vector<8x5xf32>
    %60 = vector.shape_cast %59 : vector<8x5xf32> to vector<1x8x5xf32>
    %cst_19 = arith.constant dense<0.000000e+00> : vector<1xf32>
    %61 = vector.multi_reduction <add>, %60, %cst_19 [1, 2] : vector<1x8x5xf32> to vector<1xf32>
    %62 = vector.shape_cast %61 : vector<1xf32> to vector<1x1x1xf32>
    %63 = vector.extract %62[0, 0, 0] : f32 from vector<1x1x1xf32>
    %c0_20 = arith.constant 0 : index
    %c2 = arith.constant 2 : index
    %64 = memref.load %arg4[%c0_20, %c2] : memref<1x4xf32, #tpu.memory_space<smem>>
    memref.store %63, %arg4[%c0_20, %c2] : memref<1x4xf32, #tpu.memory_space<smem>>
    %65 = arith.subf %10, %32 : vector<8x5xf32>
    %66 = arith.mulf %65, %65 : vector<8x5xf32>
    %67 = vector.shape_cast %66 : vector<8x5xf32> to vector<1x8x5xf32>
    %cst_21 = arith.constant dense<0.000000e+00> : vector<1xf32>
    %68 = vector.multi_reduction <add>, %67, %cst_21 [1, 2] : vector<1x8x5xf32> to vector<1xf32>
    %69 = vector.shape_cast %68 : vector<1xf32> to vector<1x1x1xf32>
    %70 = vector.extract %69[0, 0, 0] : f32 from vector<1x1x1xf32>
    %c0_22 = arith.constant 0 : index
    %c3 = arith.constant 3 : index
    %71 = memref.load %arg4[%c0_22, %c3] : memref<1x4xf32, #tpu.memory_space<smem>>
    memref.store %70, %arg4[%c0_22, %c3] : memref<1x4xf32, #tpu.memory_space<smem>>
    return
  }
}

</mosaic_0001>

<bundles_post_ra>
// kernel: tpu_custom_call.1
= control target key start
LH: loop header
LB: loop body
LE: loop exit
PB: predicated region body
PF: predicated region fallthrough
CT: control target
= control target key end

     0   :  { %9 = vsyncpa [#allocation3], 0  ;;  %s398_s0 = inlined_call_operand.hbm [shape: f32[8,5], index: 0, kind: input, shape index: {}]   ;;  %s399_s1 = inlined_call_operand.hbm [shape: f32[8,5], index: 1, kind: input, shape index: {}]   ;;  %s400_s2 = inlined_call_operand.hbm [shape: f32[8,5], index: 2, kind: input, shape index: {}]   ;;  %s401_s3 = inlined_call_operand.hbm [shape: f32[8,5], index: 3, kind: input, shape index: {}]   ;;  %s402_s4 = inlined_call_operand.hbm [shape: f32[1,4], index: 4, kind: output, shape index: {}]  }
   0x1   :  { %10 = vsyncpa [#allocation6], 0 }
   0x2   :  { %11 = vsyncpa [#allocation9], 0  ;;  %s29_s17 = sshll.u32 %s399_s1, 4  ;;  %s30_s17 = int_to_ptr.hbm [resolvable:$true] %s29_s17 }
   0x3   :  { %12 = vsyncpa [#allocation4], 0  ;;  %s341_s18 = smov [#allocation5]   ;;  %s18_s22 = sshll.u32 %s398_s0, 4  ;;  %s19_s22 = int_to_ptr.hbm [resolvable:$true] %s18_s22 }
   0x4   :  { %s31_s19 = sshll.u32 %s341_s18, 4  ;;  %s342_s23 = smov [#allocation2]   ;;  %s32_s19 = int_to_ptr.vmem [resolvable:$true] %s31_s19 }
   0x5   :  { %34 = dma.hbm_to_vmem [thread:$0]  %s30_s17, 128, %s32_s19, [#allocation6]  }
   0x6   :  { %s20_s24 = sshll.u32 %s342_s23, 4  ;;  %s40_s27 = sshll.u32 %s400_s2, 4  ;;  %s21_s24 = int_to_ptr.vmem [resolvable:$true] %s20_s24  ;;  %s41_s27 = int_to_ptr.hbm [resolvable:$true] %s40_s27 }
   0x7   :  { %23 = dma.hbm_to_vmem [thread:$0]  %s19_s22, 128, %s21_s24, [#allocation3]  }
   0x8   :  { %s51_s29 = sshll.u32 %s401_s3, 4  ;;  %s343_s30 = smov [#allocation7]   ;;  %s52_s29 = int_to_ptr.hbm [resolvable:$true] %s51_s29 }
   0x9   :  { %s42_s5 = sshll.u32 %s343_s30, 4  ;;  %s344_s0 = smov [#allocation8]   ;;  %s43_s5 = int_to_ptr.vmem [resolvable:$true] %s42_s5 }
   0xa   :  { %45 = dma.hbm_to_vmem [thread:$0]  %s41_s27, 128, %s43_s5, [#allocation6]  }
   0xb   :  { %s53_s6 = sshll.u32 %s344_s0, 4  ;;  %s54_s6 = int_to_ptr.vmem [resolvable:$true] %s53_s6 }
   0xc   :  { %56 = dma.hbm_to_vmem [thread:$0]  %s52_s29, 128, %s54_s6, [#allocation9]  }
   0xd   :  { %333 = dma.done.wait [#allocation3], 128  }
   0xe   :  { %334 = vsyncadd [#allocation3], 4294967168 }
   0xf   :  { %335 = dma.done.wait [#allocation6], 256  }
  0x10   :  { %336 = vsyncadd [#allocation6], 4294967040 }
  0x11   :  { %337 = dma.done.wait [#allocation9], 128  }
  0x12   :  { %338 = vsyncadd [#allocation9], 4294967168  ;;  %vm74_vm0 = vcmask 39936   ;;  %v98_v0 = vld [vmem:[#allocation7] sm:$0xff]  ;;  %v73_v1 = vld [vmem:[#allocation2] sm:$0xff]  ;;  %s183_s10 = sshll.u32 %s402_s4, 4  ;;  %s184_s10 = int_to_ptr.hbm [resolvable:$true] %s183_s10 }
  0x13   :  { %v99_v2 = vsel %vm74_vm0, %v98_v0, -inf  ;;  %v75_v3 = vsel %vm74_vm0, %v73_v1, -inf  ;;  %v110_v4 = vld [vmem:[#allocation8] sm:$0xff]  ;;  %v86_v5 = vld [vmem:[#allocation5] sm:$0xff]  ;;  %s345_s12 = smov [#allocation10]  }
  0x14   :  { %100 = vmax.xlane.f32.xlu1 %v99_v2  ;;  %76 = vmax.xlane.f32.xlu0 %v75_v3  ;;  %v111_v6 = vsel %vm74_vm0, %v110_v4, -inf  ;;  %v87_v7 = vsel %vm74_vm0, %v86_v5, -inf }
  0x1c   :  { %112 = vmax.xlane.f32.xlu1 %v111_v6  ;;  %88 = vmax.xlane.f32.xlu0 %v87_v7 }
  0x87   :  { %v101_v8 = vpop.xlane.xlu1 %100  ;;  %v77_v9 = vpop.xlane.xlu0 %76 }
  0x88   :  { %v102_v10 = vsub.f32 %v98_v0, %v101_v8  ;;  %v78_v11 = vsub.f32 %v73_v1, %v77_v9 }
  0x8a   :  { %v103_v12 = vmul.f32 1.442695, %v102_v10  ;;  %v79_v13 = vmul.f32 1.442695, %v78_v11 }
  0x8c   :  { %209 = vpow2.f32 %v103_v12 }
  0x8d   :  { %211 = vpow2.f32 %v79_v13 }
  0x8f   :  { %v113_v14 = vpop.xlane.xlu1 %112  ;;  %v89_v15 = vpop.xlane.xlu0 %88 }
  0x90   :  { %v114_v16 = vsub.f32 %v110_v4, %v113_v14  ;;  %v90_v17 = vsub.f32 %v86_v5, %v89_v15 }
  0x92   :  { %v210_v18 = vpop.eup %209  ;;  %v115_v19 = vmul.f32 1.442695, %v114_v16  ;;  %v91_v20 = vmul.f32 1.442695, %v90_v17 }
  0x93   :  { %v212_v21 = vpop.eup %211  ;;  %v105_v22 = vsel %vm74_vm0, %v210_v18, 0.0 }
  0x94   :  { %213 = vpow2.f32 %v115_v19  ;;  %106 = vadd.xlane.f32.xlu0 %v105_v22  ;;  %v81_v23 = vsel %vm74_vm0, %v212_v21, 0.0 }
  0x95   :  { %215 = vpow2.f32 %v91_v20  ;;  %82 = vadd.xlane.f32.xlu2 %v81_v23 }
  0x9a   :  { %v214_v24 = vpop.eup %213 }
  0x9b   :  { %v216_v25 = vpop.eup %215  ;;  %v117_v26 = vsel %vm74_vm0, %v214_v24, 0.0 }
  0x9c   :  { %118 = vadd.xlane.f32.xlu1 %v117_v26  ;;  %v93_v27 = vsel %vm74_vm0, %v216_v25, 0.0 }
  0x9d   :  { %94 = vadd.xlane.f32.xlu2 %v93_v27 }
 0x107   :  { %v107_v29 = vpop.xlane.xlu0 %106 }
 0x108   :  { %v83_v28 = vpop.xlane.xlu2 %82 }
 0x109   :  { %217 = vrcp.f32 %v83_v28 }
 0x10a   :  { %219 = vrcp.f32 %v107_v29 }
 0x10f   :  { %v119_v30 = vpop.xlane.xlu1 %118  ;;  %v218_v32 = vpop.eup %217 }
 0x110   :  { %221 = vrcp.f32 %v119_v30  ;;  %v95_v31 = vpop.xlane.xlu2 %94  ;;  %v220_v33 = vpop.eup %219  ;;  %v85_v36 = vmul.f32 %v218_v32, %v212_v21 }
 0x111   :  { %223 = vrcp.f32 %v95_v31  ;;  %v109_v39 = vmul.f32 %v220_v33, %v210_v18 }
 0x113   :  { %v164_v49 = vsub.f32 %v85_v36, %v109_v39 }
 0x115   :  { %v165_v50 = vmul.f32 %v164_v49, %v164_v49 }
 0x116   :  { %v222_v34 = vpop.eup %221 }
 0x117   :  { %v224_v35 = vpop.eup %223  ;;  %v121_v37 = vmul.f32 %v222_v34, %v214_v24  ;;  %v166_v51 = vsel %vm74_vm0, %v165_v50, 0.0 }
 0x118   :  { %v97_v38 = vmul.f32 %v224_v35, %v216_v25 }
 0x119   :  { %v136_v40 = vsub.f32 %v85_v36, %v121_v37 }
 0x11a   :  { %v150_v41 = vsub.f32 %v97_v38, %v85_v36  ;;  %v122_v42 = vsub.f32 %v109_v39, %v97_v38 }
 0x11b   :  { %v137_v43 = vmul.f32 %v136_v40, %v136_v40 }
 0x11c   :  { %v151_v44 = vmul.f32 %v150_v41, %v150_v41  ;;  %v123_v45 = vmul.f32 %v122_v42, %v122_v42 }
 0x11d   :  { %v138_v46 = vsel %vm74_vm0, %v137_v43, 0.0 }
 0x11e   :  { %139 = vadd.xlane.f32.xlu0 %v138_v46  ;;  %v152_v47 = vsel %vm74_vm0, %v151_v44, 0.0  ;;  %v124_v48 = vsel %vm74_vm0, %v123_v45, 0.0 }
 0x11f   :  { %153 = vadd.xlane.f32.xlu1 %v152_v47  ;;  %125 = vadd.xlane.f32.xlu2 %v124_v48 }
 0x127   :  { %167 = vadd.xlane.f32.xlu2 %v166_v51 }
 0x191   :  { %v140_v52 = vpop.xlane.xlu0 %139 }
 0x192   :  { %v154_v53 = vpop.xlane.xlu1 %153  ;;  %v126_v54 = vpop.xlane.xlu2 %125  ;;  %v141_v55 = vrot.slane %v140_v52, 4 }
 0x193   :  { %v155_v56 = vrot.slane %v154_v53, 4  ;;  %v127_v57 = vrot.slane %v126_v54, 4 }
 0x194   :  { %v142_v58 = vadd.f32 %v141_v55, %v140_v52 }
 0x195   :  { %v156_v59 = vadd.f32 %v155_v56, %v154_v53  ;;  %v128_v60 = vadd.f32 %v127_v57, %v126_v54 }
 0x196   :  { %v143_v61 = vrot.slane %v142_v58, 2 }
 0x197   :  { %v157_v62 = vrot.slane %v156_v59, 2  ;;  %v129_v63 = vrot.slane %v128_v60, 2 }
 0x198   :  { %v144_v0 = vadd.f32 %v143_v61, %v142_v58 }
 0x199   :  { %v158_v1 = vadd.f32 %v157_v62, %v156_v59  ;;  %v130_v2 = vadd.f32 %v129_v63, %v128_v60 }
 0x19a   :  { %v168_v3 = vpop.xlane.xlu2 %167  ;;  %v145_v4 = vrot.slane %v144_v0, 1 }
 0x19b   :  { %v169_v5 = vrot.slane %v168_v3, 4  ;;  %v131_v6 = vrot.slane %v130_v2, 1  ;;  %v159_v7 = vrot.slane %v158_v1, 1 }
 0x19c   :  { %v146_v8 = vadd.f32 %v145_v4, %v144_v0 }
 0x19d   :  { %v170_v9 = vadd.f32 %v169_v5, %v168_v3  ;;  %v132_v10 = vadd.f32 %v131_v6, %v130_v2  ;;  %v160_v11 = vadd.f32 %v159_v7, %v158_v1 }
 0x19f   :  { %v171_v12 = vrot.slane %v170_v9, 2  ;;  %196 = vpush %v132_v10 }
 0x1a0   :  { %198 = vpush %v146_v8 }
 0x1a1   :  { %v172_v13 = vadd.f32 %v171_v12, %v170_v9  ;;  %200 = vpush %v160_v11 }
 0x1a3   :  { %v173_v14 = vrot.slane %v172_v13, 1 }
 0x1a5   :  { %v174_v15 = vadd.f32 %v173_v14, %v172_v13 }
 0x1a7   :  { %202 = vpush %v174_v15 }
 0x1d0   :  { %s197_s2 = spop %196 }
 0x1d1   :  { %135 = sst [smem:[#allocation10]] %s197_s2  ;;  %s199_s3 = spop %198 }
 0x1d2   :  { %149 = sst [smem:[#allocation10 + $0x1]] %s199_s3  ;;  %s201_s7 = spop %200 }
 0x1d3   :  { %163 = sst [smem:[#allocation10 + $0x2]] %s201_s7 }
 0x1d8   :  { %s203_s11 = spop %202 }
 0x1d9   :  { %177 = sst [smem:[#allocation10 + $0x3]] %s203_s11 }
 0x1da   :  { %186 = dma.smem_to_hbm %s345_s12, 16, %s184_s10, [#allocation4]  }
 0x1db   :  { %339 = dma.done.wait [#allocation4], 16  }
 0x1dc   :  { %340 = vsyncadd [#allocation4], 4294967280 }
 0x1dd   :  { %191 = sfence }
 0x1de   :  { %192 = vsyncpa [#allocation3], 1 }
 0x1df   :  { %193 = vsyncpa [#allocation6], 1 }
 0x1e0   :  { %194 = vsyncpa [#allocation9], 1 }
 0x1e1   :  { %195 = vsyncpa [#allocation4], 1 }

</bundles_post_ra>
